<compile_context>
chip_gen: v5e
topology: v5e:2x2
jax: 0.10.0
libtpu: 0.0.40
codegen_flags: <defaults>
</compile_context>

<pallas_src>
import functools

import jax
import jax.numpy as jnp
from jax import lax
from jax.experimental import pallas as pl
from jax.experimental.pallas import tpu as pltpu

LAMBD = 0.0051
ALPHA = 0.1
BN_EPS = 1e-5

# Per-grid-row partial-loss block is one native (8, 128) f32 tile so the
# output BlockSpec satisfies TPU tiling constraints.
_PART_SUB = 8
_PART_LANE = 128


# --------------------------------------------------------------------------
# Kernel: accumulate sum(c_block ** 2) per row-block i of c.
# Inputs are already batch-normalized, 1/sqrt(N)-scaled, compute-dtype slabs.
# --------------------------------------------------------------------------
def _corr_sq_kernel(za_ref, zb_ref, part_ref):
    j = pl.program_id(1)

    @pl.when(j == 0)
    def _init():
        # Output block for row-block i is resident across the whole j sweep.
        part_ref[...] = jnp.zeros_like(part_ref)

    # c block (TDI, TDJ) = slab_a.T @ slab_b ; contraction over the batch dim.
    # (sum(c^2) is transpose-invariant, so either operand order is legal.)
    c = lax.dot_general(
        za_ref[...], zb_ref[...],
        dimension_numbers=(((0,), (0,)), ((), ())),
        preferred_element_type=jnp.float32,
    )
    part_ref[...] += jnp.sum(c * c)


# --------------------------------------------------------------------------
# VMEM budgeting / tile selection (generation aware).
# --------------------------------------------------------------------------
def _vmem_budget():
    try:
        cap = int(pltpu.get_tpu_info().vmem_capacity_bytes)
    except Exception:  # interpret mode / older runtimes
        cap = 64 << 20  # conservative (v7x per-core VMEM)
    budget = max(cap - (16 << 20), 16 << 20)   # headroom for Mosaic scratch
    limit = max(cap - (8 << 20), 32 << 20)     # explicit scoped-VMEM limit
    return budget, limit


def _divisor_candidates(d):
    cands = {c for c in (2048, 1024, 512, 256, 128) if d % c == 0}
    cands.add(d)
    return sorted(cands, reverse=True)


def _pick_tiles(n, d, itemsize, budget):
    """Pick (TDI, TDJ): large resident i-slab (cuts z_b HBM re-reads), wide
    j-slab (cuts grid-step overhead), constrained by the VMEM budget."""
    if d % 128 != 0:
        # TODO(synk): pad/mask D that is not a multiple of 128 for large
        # ragged feature dims; small D is taken as a single full tile.
        return d, d
    cands = _divisor_candidates(d)
    # Keep gi >= 2 when possible so v7x's two TensorCores can split axis i.
    max_tdi = d // 2 if (d >= 256 and (d // 2) % 128 == 0) else d
    tdi_cands = [c for c in cands if c <= max_tdi] or cands
    for tdi in tdi_cands:
        for tdj in cands:
            vmem = ((2 * n * tdi + 2 * n * tdj) * itemsize   # dbl-buffered slabs
                    + 2 * tdi * tdj * 4                      # c and c*c (f32)
                    + 2 * _PART_SUB * _PART_LANE * 4)        # output block
            if vmem <= budget:
                return tdi, tdj
    return tdi_cands[-1], cands[-1]


# --------------------------------------------------------------------------
# Wrapper: BatchNorm + scaling + cast (once), Pallas off-diag energy, cheap
# f32 diagonal / sum(c_) / sum(mask) terms.
# --------------------------------------------------------------------------
@functools.partial(jax.jit, static_argnames=("compute_dtype",))
def barlow_twins_head_v3(z_a, z_b, gt_label, *, compute_dtype=jnp.bfloat16):
    """Returns {'loss': scalar} matching BarlowTwinsHeadV3.forward."""
    n, d = z_a.shape
    za = z_a.astype(jnp.float32)
    zb = z_b.astype(jnp.float32)

    def bn(v):  # BatchNorm1d(affine=False), training-mode (biased var)
        mean = jnp.mean(v, axis=0, keepdims=True)
        var = jnp.mean((v - mean) ** 2, axis=0, keepdims=True)
        return (v - mean) * lax.rsqrt(var + BN_EPS)

    a = bn(za)                      # (N, D) f32
    b = bn(zb)                      # (N, D) f32

    # Fold the 1/N of `c.div_(N)` symmetrically so c-tile entries stay O(1)
    # and the bf16 cast keeps full relative precision.
    scale = jnp.float32(1.0) / jnp.sqrt(jnp.float32(n))
    a_s = (a * scale).astype(compute_dtype)
    b_s = (b * scale).astype(compute_dtype)

    itemsize = jnp.dtype(compute_dtype).itemsize
    budget, vmem_limit = _vmem_budget()
    tdi, tdj = _pick_tiles(n, d, itemsize, budget)
    gi, gj = d // tdi, d // tdj

    cost = pl.CostEstimate(
        flops=2 * n * d * d,
        transcendentals=0,
        bytes_accessed=int(n * d * itemsize * (1 + gi)
                           + gi * _PART_SUB * _PART_LANE * 4),
    )

    partials = pl.pallas_call(
        _corr_sq_kernel,
        out_shape=jax.ShapeDtypeStruct((gi, _PART_SUB, _PART_LANE), jnp.float32),
        grid_spec=pltpu.PrefetchScalarGridSpec(
            num_scalar_prefetch=0,
            grid=(gi, gj),
            in_specs=[
                pl.BlockSpec((n, tdi), lambda i, j: (0, i)),  # z_a slab i (resident)
                pl.BlockSpec((n, tdj), lambda i, j: (0, j)),  # z_b slab j (streamed)
            ],
            out_specs=pl.BlockSpec((1, _PART_SUB, _PART_LANE),
                                   lambda i, j: (i, 0, 0)),
        ),
        compiler_params=pltpu.CompilerParams(
            dimension_semantics=("parallel", "arbitrary"),
            vmem_limit_bytes=int(vmem_limit),
        ),
        cost_estimate=cost,
    )(a_s, b_s)

    sum_c2 = jnp.sum(partials[:, 0, 0])            # == sum(c**2), c = A^T B / N

    # Diagonal of c, elementwise, in f32 (no bf16 rounding near 1).
    diag = jnp.sum(a * b, axis=0) / jnp.float32(n)
    on_diag = jnp.sum((diag - 1.0) ** 2)
    off_diag = sum_c2 - jnp.sum(diag * diag)

    # TODO(synk): torch.distributed.all_reduce(c) — identity at world size 1
    # (a data-parallel run would need a cross-device psum of c here).
    # sum(c_) = sum(bn(z_a) @ bn(z_b).T) == dot(colsum(A), colsum(B)) — the
    # (N, N) matmul is never formed; analytically ~0 for batch-normed data.
    sum_c_ = jnp.dot(jnp.sum(a, axis=0), jnp.sum(b, axis=0))

    # sum(mask) = sum over label classes of count^2 (no N x N boolean mask).
    gt = jnp.ravel(gt_label)
    gt_sorted = jnp.sort(gt)
    new_grp = jnp.concatenate(
        [jnp.ones((1,), dtype=jnp.bool_), gt_sorted[1:] != gt_sorted[:-1]])
    grp = jnp.cumsum(new_grp) - 1
    counts = jnp.zeros((gt.size,), jnp.float32).at[grp].add(1.0)
    sum_mask = jnp.sum(counts * counts)

    loss = (on_diag + jnp.float32(LAMBD) * off_diag
            - jnp.float32(ALPHA) * (sum_c_ - sum_mask))
    return {"loss": loss}


# --------------------------------------------------------------------------
# Pure-JAX reference mirroring the PyTorch module (single device).
# --------------------------------------------------------------------------
def _reference(z_a, z_b, gt_label):
    n, d = z_a.shape
    x = z_a.astype(jnp.float32)
    y = z_b.astype(jnp.float32)

    def bn(v):
        mean = jnp.mean(v, axis=0, keepdims=True)
        var = jnp.mean((v - mean) ** 2, axis=0, keepdims=True)
        return (v - mean) * lax.rsqrt(var + BN_EPS)

    za_n = bn(x)
    zb_n = bn(y)
    c = (za_n.T @ zb_n) / n
    on_diag = jnp.sum((jnp.diag(c) - 1.0) ** 2)
    off_diag = jnp.sum(c ** 2) - jnp.sum(jnp.diag(c) ** 2)
    loss = on_diag + LAMBD * off_diag
    c_ = za_n @ zb_n.T
    gt = jnp.ravel(gt_label).reshape(-1, 1)
    mask = (gt == gt.T).astype(jnp.float32)
    loss = loss - ALPHA * jnp.sum(c_ - mask)
    return loss


if __name__ == "__main__":
    N, D = 8, 32  # small synthetic shapes consistent with (N, D) inputs
    key = jax.random.PRNGKey(0)
    k1, k2, k3 = jax.random.split(key, 3)
    z_a = jax.random.normal(k1, (N, D), dtype=jnp.float32)
    z_b = jax.random.normal(k2, (N, D), dtype=jnp.float32)
    gt_label = jax.random.randint(k3, (N,), 0, 4, dtype=jnp.int32)

    ref = jax.block_until_ready(_reference(z_a, z_b, gt_label))

    # Tight check with f32 MXU inputs.
    out_f32 = barlow_twins_head_v3(z_a, z_b, gt_label, compute_dtype=jnp.float32)
    loss_f32 = jax.block_until_ready(out_f32["loss"])
    assert jnp.allclose(loss_f32, ref, rtol=1e-4, atol=1e-4), (loss_f32, ref)

    # Default fast path: bf16 slabs, f32 accumulation (looser tolerance).
    out_bf16 = barlow_twins_head_v3(z_a, z_b, gt_label, compute_dtype=jnp.bfloat16)
    loss_bf16 = jax.block_until_ready(out_bf16["loss"])
    assert jnp.allclose(loss_bf16, ref, rtol=2e-2, atol=2e-2), (loss_bf16, ref)

    print("KERNEL_OK")
</pallas_src>

<mosaic_0001>
module attributes {stable_mosaic.version = 11 : i64} {
  func.func @_corr_sq_kernel(%arg0: i32, %arg1: i32, %arg2: memref<8x32xf32, #tpu.memory_space<vmem>>, %arg3: memref<8x32xf32, #tpu.memory_space<vmem>>, %arg4: memref<1x8x128xf32, #tpu.memory_space<vmem>>) attributes {dimension_semantics = [#tpu.dimension_semantics<parallel>, #tpu.dimension_semantics<arbitrary>], iteration_bounds = array<i64: 1, 1>, scalar_prefetch = 0 : i64, scratch_operands = 0 : i64, tpu.core_type = #tpu.core_type<tc>, window_params = [{transform_indices = @transform_0, window_bounds = array<i64: 8, 32>}, {transform_indices = @transform_1, window_bounds = array<i64: 8, 32>}, {transform_indices = @transform_2, window_bounds = array<i64: 1, 8, 128>}]} {
    %c0_i32 = arith.constant 0 : i32
    %0 = arith.cmpi eq, %arg1, %c0_i32 : i32
    %1 = arith.extui %0 : i1 to i32
    %c0_i32_0 = arith.constant 0 : i32
    %2 = arith.cmpi ne, %1, %c0_i32_0 : i32
    scf.if %2 {
      %cst_11 = arith.constant 0.000000e+00 : f32
      %15 = vector.broadcast %cst_11 : f32 to vector<1x8x128xf32>
      %c0_12 = arith.constant 0 : index
      %c0_13 = arith.constant 0 : index
      %c0_14 = arith.constant 0 : index
      %16 = vector.load %arg4[%c0_12, %c0_13, %c0_14] : memref<1x8x128xf32, #tpu.memory_space<vmem>>, vector<1x8x128xf32>
      tpu.vector_store %arg4[%c0_12, %c0_13, %c0_14], %15 {strides = array<i32>} : memref<1x8x128xf32, #tpu.memory_space<vmem>>, vector<1x8x128xf32>,
    } else {
    }
    %c0 = arith.constant 0 : index
    %c0_1 = arith.constant 0 : index
    %3 = vector.load %arg2[%c0, %c0_1] : memref<8x32xf32, #tpu.memory_space<vmem>>, vector<8x32xf32>
    %c0_2 = arith.constant 0 : index
    %c0_3 = arith.constant 0 : index
    %4 = vector.load %arg3[%c0_2, %c0_3] : memref<8x32xf32, #tpu.memory_space<vmem>>, vector<8x32xf32>
    %cst = arith.constant dense<0.000000e+00> : vector<32x32xf32>
    %5 = tpu.matmul %3, %4, %cst {dimension_numbers = #tpu.dot_dimension_numbers<[0], [0], [1], [1], [0, 1, 1, 1], [], []>} : vector<8x32xf32>, vector<8x32xf32>, vector<32x32xf32> -> vector<32x32xf32>
    %c0_4 = arith.constant 0 : index
    %c0_5 = arith.constant 0 : index
    %c0_6 = arith.constant 0 : index
    %6 = vector.load %arg4[%c0_4, %c0_5, %c0_6] : memref<1x8x128xf32, #tpu.memory_space<vmem>>, vector<1x8x128xf32>
    %7 = arith.mulf %5, %5 : vector<32x32xf32>
    %8 = vector.shape_cast %7 : vector<32x32xf32> to vector<1x32x32xf32>
    %cst_7 = arith.constant dense<0.000000e+00> : vector<1xf32>
    %9 = vector.multi_reduction <add>, %8, %cst_7 [1, 2] : vector<1x32x32xf32> to vector<1xf32>
    %10 = vector.shape_cast %9 : vector<1xf32> to vector<1x1x1xf32>
    %11 = vector.extract %10[0, 0, 0] : f32 from vector<1x1x1xf32>
    %12 = vector.broadcast %11 : f32 to vector<1x8x128xf32>
    %13 = arith.addf %6, %12 : vector<1x8x128xf32>
    %c0_8 = arith.constant 0 : index
    %c0_9 = arith.constant 0 : index
    %c0_10 = arith.constant 0 : index
    %14 = vector.load %arg4[%c0_8, %c0_9, %c0_10] : memref<1x8x128xf32, #tpu.memory_space<vmem>>, vector<1x8x128xf32>
    tpu.vector_store %arg4[%c0_8, %c0_9, %c0_10], %13 {strides = array<i32>} : memref<1x8x128xf32, #tpu.memory_space<vmem>>, vector<1x8x128xf32>,
    return
  }
  func.func @transform_0(%arg0: i32, %arg1: i32) -> (i32, i32) {
    %c0_i32 = arith.constant 0 : i32
    %c0_i32_0 = arith.constant 0 : i32
    return %c0_i32, %arg0 : i32, i32
  }
  func.func @transform_1(%arg0: i32, %arg1: i32) -> (i32, i32) {
    %c0_i32 = arith.constant 0 : i32
    %c0_i32_0 = arith.constant 0 : i32
    return %c0_i32, %arg1 : i32, i32
  }
  func.func @transform_2(%arg0: i32, %arg1: i32) -> (i32, i32, i32) {
    %c0_i32 = arith.constant 0 : i32
    %c0_i32_0 = arith.constant 0 : i32
    %c0_i32_1 = arith.constant 0 : i32
    return %arg0, %c0_i32, %c0_i32_0 : i32, i32, i32
  }
}

</mosaic_0001>

<bundles_post_ra>
// kernel: barlow_twins_head_v3.1
= control target key start
LH: loop header
LB: loop body
LE: loop exit
PB: predicated region body
PF: predicated region fallthrough
CT: control target
= control target key end

     0   :  { %vm50_vm0 = vcmask 64512   ;;  %vm97_vm1 = vcmask 261120   ;;  %s155_s0 = inlined_call_operand.vmem [shape: f32[8,32], index: 0, kind: input, shape index: {}]   ;;  %s156_s1 = inlined_call_operand.vmem [shape: f32[8,32], index: 1, kind: input, shape index: {}]   ;;  %s157_s2 = inlined_call_operand.vmem [shape: f32[1,8,128], index: 2, kind: output, shape index: {}]  }
   0x1   :  { %v16_v0 = vld [vmem:[%s155_s0] sm:$0xff] }
   0x2   :  { %v17_v1 = vld [vmem:[%s156_s1] sm:$0xff]  ;;  %18 = vxpose.xlu0.b32.start.end [1/1] (short) (narrow) %v16_v0, 32 }
   0x3   :  { %78 = vmatpush.msra.mxu0 %v17_v1  ;;  %125 = vmatpush.msra.mxu1 %v17_v1 }
   0x4   :  { %126 = vmatpush.msra.mxu2 %v17_v1  ;;  %127 = vmatpush.msra.mxu3 %v17_v1 }
  0xa6   :  { %v34_v2 = vpop.trf.xlu0 }
  0xa7   :  { %121 = vmatmul.msk.f32.vlgmr.msra.gmra.mxu0 %vm50_vm0, %v34_v2 }
  0xae   :  { %v35_v3 = vpop.trf.xlu0 }
  0xaf   :  { %122 = vmatmul.msk.f32.vlgmr.msra.gmra.mxu1 %vm50_vm0, %v35_v3 }
  0xb6   :  { %v36_v4 = vpop.trf.xlu0 }
  0xb7   :  { %123 = vmatmul.msk.f32.vlgmr.msra.gmra.mxu2 %vm50_vm0, %v36_v4 }
  0xbe   :  { %v37_v5 = vpop.trf.xlu0 }
  0xbf   :  { %124 = vmatmul.msk.f32.vlgmr.msra.gmra.mxu3 %vm50_vm0, %v37_v5 }
 0x124   :  { %v80_v7 = vpop.f32.mrf.mxu0 }
 0x125   :  { %v93_v10 = vmul.f32 %v80_v7, %v80_v7 }
 0x127   :  { %v98_v13 = vsel %vm97_vm1, %v93_v10, 0.0 }
 0x12c   :  { %v83_v6 = vpop.f32.mrf.mxu1 }
 0x12d   :  { %v94_v9 = vmul.f32 %v83_v6, %v83_v6 }
 0x12f   :  { %v99_v12 = vsel %vm97_vm1, %v94_v9, 0.0 }
 0x130   :  { %v100_v15 = vadd.f32 %v99_v12, %v98_v13 }
 0x13a   :  { %v86_v8 = vpop.f32.mrf.mxu2 }
 0x13b   :  { %v95_v11 = vmul.f32 %v86_v8, %v86_v8 }
 0x13d   :  { %v101_v14 = vsel %vm97_vm1, %v95_v11, 0.0 }
 0x13e   :  { %v102_v18 = vadd.f32 %v101_v14, %v100_v15 }
 0x142   :  { %v89_v16 = vpop.f32.mrf.mxu3 }
 0x143   :  { %v96_v17 = vmul.f32 %v89_v16, %v89_v16 }
 0x145   :  { %v103_v19 = vsel %vm97_vm1, %v96_v17, 0.0 }
 0x146   :  { %v104_v20 = vadd.f32 %v103_v19, %v102_v18 }
 0x148   :  { %105 = vadd.xlane.f32.xlu0 %v104_v20 }
 0x1bb   :  { %v106_v21 = vpop.xlane.xlu0 %105 }
 0x1bc   :  { %v107_v22 = vrot.slane %v106_v21, 4 }
 0x1be   :  { %v108_v23 = vadd.f32 %v107_v22, %v106_v21 }
 0x1c0   :  { %v109_v24 = vrot.slane %v108_v23, 2 }
 0x1c2   :  { %v110_v25 = vadd.f32 %v109_v24, %v108_v23 }
 0x1c4   :  { %v111_v26 = vrot.slane %v110_v25, 1 }
 0x1c6   :  { %v112_v27 = vadd.f32 %v111_v26, %v110_v25 }
 0x1c8   :  { %128 = vpush %v112_v27 }
 0x1f9   :  { %s129_s0 = spop %128 }
 0x1fa   :  { %v114_v28 = vstv %s129_s0 }
 0x1fb   :  { %116 = vst [vmem:[%s157_s2] sm:$0xff] %v114_v28 }

</bundles_post_ra>
